<compile_context>
chip_gen: v6e
topology: v6e:2x2x1
jax: 0.10.0
libtpu: 0.0.40
codegen_flags: <defaults>
</compile_context>

<pallas_src>
import numpy as np
import jax
import jax.numpy as jnp
from jax.experimental import pallas as pl
from jax.experimental.pallas import tpu as pltpu


def _round_up(x, m):
    return (x + m - 1) // m * m


def double_conv_forward(x_nchw, params, *, compute_dtype=jnp.bfloat16):
    """Forward pass equivalent to DoubleConv.forward. Input/output are NCHW."""
    w1, b1 = params["w1"], params["b1"]
    w2, b2 = params["w2"], params["b2"]
    N, Cin, H, W = x_nchw.shape
    Cout = w1.shape[-1]
    M = H * W
    Mm = _round_up(M, 128)               # lane-aligned flat-plane width

    # Tap order (kh, kw) and the corresponding flat-plane lane shifts.
    offsets = [(dkh, dkw) for dkh in (-1, 0, 1) for dkw in (-1, 0, 1)]
    shifts = [dkh * W + dkw for dkh, dkw in offsets]

    # Per-tap weight matrices (tap, Cout, Cin) in the MXU compute dtype; K = C per tap, so no
    # zero-padded K columns are streamed through the MXU.
    w1_taps = jnp.transpose(w1, (0, 1, 3, 2)).reshape(9, Cout, Cin).astype(compute_dtype)
    w2_taps = jnp.transpose(w2, (0, 1, 3, 2)).reshape(9, Cout, Cout).astype(compute_dtype)
    b1c = b1.reshape(Cout, 1).astype(jnp.float32)
    b2c = b2.reshape(Cout, 1).astype(jnp.float32)

    # Per-tap 0/1 boundary masks over the flat plane: 1 where the shifted read stays inside the
    # image for that tap — exactly the zero-padding=1 contribution pattern. All cyclic-wrap and
    # tail-lane reads fall on masked (zeroed) positions, so no halo plane is needed.
    idx = np.arange(Mm)
    row, col = idx // W, idx % W
    valid = idx < M
    masks_np = np.stack([
        (valid & (row + dkh >= 0) & (row + dkh < H)
               & (col + dkw >= 0) & (col + dkw < W)).astype(np.float32)
        for dkh, dkw in offsets])                      # (9, Mm)
    masks = jnp.asarray(masks_np).astype(compute_dtype)

    # Lane-dense input: one contiguous (1, Cin, Mm) block per grid step (free reshape; the pad
    # below is a no-op when H*W is already a multiple of 128).
    x_flat = x_nchw.reshape(N, Cin, M)
    if Mm != M:
        x_flat = jnp.pad(x_flat, ((0, 0), (0, 0), (0, Mm - M)))

    def conv3x3_relu(xc, w_ref, b_ref, mask_ref, cin):
        # 9 accumulating MXU matmuls; each tap's input is a cyclic lane shift of the flat plane,
        # zeroed at image borders by the tap mask (no halo scratch, no im2col matrix).
        acc = None
        for t, s in enumerate(shifts):
            shifted = xc if s == 0 else pltpu.roll(xc, (-s) % Mm, 1)
            patch = shifted * mask_ref[pl.ds(t, 1), :]              # (cin, Mm) * (1, Mm)
            part = jnp.dot(w_ref[t], patch, preferred_element_type=jnp.float32)
            acc = part if acc is None else acc + part
        return jnp.maximum(acc + b_ref[...], 0.0)                   # (Cout, Mm) f32

    def kernel(x_ref, w1_ref, b1_ref, w2_ref, b2_ref, mask_ref, o_ref):
        xc = x_ref[0, :, :].astype(compute_dtype)                   # (Cin, Mm), one dense load
        h = conv3x3_relu(xc, w1_ref, b1_ref, mask_ref, Cin).astype(compute_dtype)
        out = conv3x3_relu(h, w2_ref, b2_ref, mask_ref, Cout)
        o_ref[0, :, :] = out.astype(o_ref.dtype)                    # one lane-dense store

    # VMEM budget computed from actual buffer sizes (double-buffered pipelined blocks + live
    # values) with headroom, capped below v7x's 64 MiB physical VMEM.
    cd_bytes = jnp.dtype(compute_dtype).itemsize
    io_bytes = jnp.dtype(x_nchw.dtype).itemsize
    block_bytes = (Cin * Mm * io_bytes                 # input block
                   + 9 * Cout * (Cin + Cout) * cd_bytes  # per-tap weights
                   + 2 * Cout * 4                        # biases
                   + 9 * Mm * cd_bytes                   # masks
                   + Cout * Mm * io_bytes)               # output block
    value_bytes = (Cout * Mm * 4                         # f32 accumulator
                   + Cout * Mm * cd_bytes                # conv1 activation
                   + 2 * max(Cin, Cout) * Mm * cd_bytes) # shifted/masked tap temporaries
    vmem_limit = int(min(48 * 2**20, max(16 * 2**20, 2 * (2 * block_bytes + value_bytes))))

    out_flat = pl.pallas_call(
        kernel,
        out_shape=jax.ShapeDtypeStruct((N, Cout, Mm), x_nchw.dtype),
        grid_spec=pltpu.PrefetchScalarGridSpec(
            num_scalar_prefetch=0,
            grid=(N,),
            in_specs=[
                pl.BlockSpec((1, Cin, Mm), lambda n: (n, 0, 0)),
                # Grid-invariant operands (constant index maps -> DMA'd once, not per step).
                pl.BlockSpec((9, Cout, Cin), lambda n: (0, 0, 0)),
                pl.BlockSpec((Cout, 1), lambda n: (0, 0)),
                pl.BlockSpec((9, Cout, Cout), lambda n: (0, 0, 0)),
                pl.BlockSpec((Cout, 1), lambda n: (0, 0)),
                pl.BlockSpec((9, Mm), lambda n: (0, 0)),
            ],
            out_specs=pl.BlockSpec((1, Cout, Mm), lambda n: (n, 0, 0)),
        ),
        compiler_params=pltpu.CompilerParams(
            dimension_semantics=("parallel",),
            vmem_limit_bytes=vmem_limit,
        ),
    )(x_flat, w1_taps, b1c, w2_taps, b2c, masks)

    # Strip the (possibly empty) lane tail and merge back to NCHW — both are cheap wrapper ops.
    return out_flat[:, :, :M].reshape(N, Cout, H, W)


def init_double_conv_params(key, in_channels, out_channels, dtype=jnp.float32):
    """Deterministic parameter init mirroring the shapes in DoubleConv.__init__."""
    k1, k2, k3, k4 = jax.random.split(key, 4)
    fan1 = in_channels * 9
    w1 = jax.random.uniform(k1, (3, 3, in_channels, out_channels), dtype,
                            minval=-1.0, maxval=1.0) / jnp.sqrt(fan1)
    b1 = jax.random.uniform(k2, (out_channels,), dtype,
                            minval=-1.0, maxval=1.0) / jnp.sqrt(fan1)
    fan2 = out_channels * 9
    w2 = jax.random.uniform(k3, (3, 3, out_channels, out_channels), dtype,
                            minval=-1.0, maxval=1.0) / jnp.sqrt(fan2)
    b2 = jax.random.uniform(k4, (out_channels,), dtype,
                            minval=-1.0, maxval=1.0) / jnp.sqrt(fan2)
    return dict(w1=w1, b1=b1, w2=w2, b2=b2)


def _reference_double_conv(x_nchw, params):
    """Pure-JAX reference (lax conv) for a correctness check."""
    def conv(x, w, b):
        wt = jnp.transpose(w, (3, 2, 0, 1))  # (3,3,Cin,Cout) -> OIHW
        y = jax.lax.conv_general_dilated(
            x, wt, window_strides=(1, 1), padding=((1, 1), (1, 1)),
            dimension_numbers=("NCHW", "OIHW", "NCHW"))
        return jax.nn.relu(y + b[None, :, None, None])
    h = conv(x_nchw, params["w1"], params["b1"])
    return conv(h, params["w2"], params["b2"])


if __name__ == "__main__":
    key = jax.random.PRNGKey(0)
    kx, kp = jax.random.split(key)

    N, Cin, H, W = 2, 4, 16, 16
    Cout = 8
    x = jax.random.normal(kx, (N, Cin, H, W), jnp.float32)
    params = init_double_conv_params(kp, Cin, Cout)

    ref = jax.block_until_ready(_reference_double_conv(x, params))

    # Strict correctness gate: f32 compute path.
    out_f32 = jax.block_until_ready(
        double_conv_forward(x, params, compute_dtype=jnp.float32))
    assert out_f32.shape == (N, Cout, H, W)
    assert jnp.allclose(out_f32, ref, atol=1e-4, rtol=1e-4)

    # Default (fast) path: bf16 MXU inputs with f32 accumulation -> looser tolerance.
    out_bf16 = jax.block_until_ready(double_conv_forward(x, params))
    assert out_bf16.shape == (N, Cout, H, W)
    assert jnp.allclose(out_bf16, ref, atol=5e-2, rtol=5e-2)

    print("KERNEL_OK")
</pallas_src>

<mosaic_0001>
module attributes {stable_mosaic.version = 11 : i64} {
  func.func @kernel(%arg0: i32, %arg1: memref<1x4x256xf32, #tpu.memory_space<vmem>>, %arg2: memref<9x8x4xf32, #tpu.memory_space<vmem>>, %arg3: memref<8x1xf32, #tpu.memory_space<vmem>>, %arg4: memref<9x8x8xf32, #tpu.memory_space<vmem>>, %arg5: memref<8x1xf32, #tpu.memory_space<vmem>>, %arg6: memref<9x256xf32, #tpu.memory_space<vmem>>, %arg7: memref<1x8x256xf32, #tpu.memory_space<vmem>>) attributes {dimension_semantics = [#tpu.dimension_semantics<parallel>], iteration_bounds = array<i64: 2>, scalar_prefetch = 0 : i64, scratch_operands = 0 : i64, tpu.core_type = #tpu.core_type<tc>, window_params = [{transform_indices = @transform_0, window_bounds = array<i64: 1, 4, 256>}, {pipeline_mode = #tpu.pipeline_mode<synchronous>, transform_indices = @transform_1, window_bounds = array<i64: 9, 8, 4>}, {pipeline_mode = #tpu.pipeline_mode<synchronous>, transform_indices = @transform_2, window_bounds = array<i64: 8, 1>}, {pipeline_mode = #tpu.pipeline_mode<synchronous>, transform_indices = @transform_3, window_bounds = array<i64: 9, 8, 8>}, {pipeline_mode = #tpu.pipeline_mode<synchronous>, transform_indices = @transform_4, window_bounds = array<i64: 8, 1>}, {pipeline_mode = #tpu.pipeline_mode<synchronous>, transform_indices = @transform_5, window_bounds = array<i64: 9, 256>}, {transform_indices = @transform_6, window_bounds = array<i64: 1, 8, 256>}]} {
    %c0 = arith.constant 0 : index
    %c0_0 = arith.constant 0 : index
    %c0_1 = arith.constant 0 : index
    %0 = vector.load %arg1[%c0, %c0_0, %c0_1] : memref<1x4x256xf32, #tpu.memory_space<vmem>>, vector<1x4x256xf32>
    %1 = vector.shape_cast %0 : vector<1x4x256xf32> to vector<4x256xf32>
    %c17_i32 = arith.constant 17 : i32
    %2 = tpu.dynamic_rotate %1 by %c17_i32 dim 1 : vector<4x256xf32>, i32 -> vector<4x256xf32>
    %c0_2 = arith.constant 0 : index
    %c0_3 = arith.constant 0 : index
    %3 = vector.load %arg6[%c0_2, %c0_3] : memref<9x256xf32, #tpu.memory_space<vmem>>, vector<1x256xf32>
    %4 = vector.broadcast %3 : vector<1x256xf32> to vector<4x256xf32>
    %5 = arith.mulf %2, %4 : vector<4x256xf32>
    %c0_4 = arith.constant 0 : index
    %c0_5 = arith.constant 0 : index
    %c0_6 = arith.constant 0 : index
    %6 = vector.load %arg2[%c0_4, %c0_5, %c0_6] : memref<9x8x4xf32, #tpu.memory_space<vmem>>, vector<1x8x4xf32>
    %7 = vector.shape_cast %6 : vector<1x8x4xf32> to vector<8x4xf32>
    %cst = arith.constant dense<0.000000e+00> : vector<8x256xf32>
    %8 = tpu.matmul %7, %5, %cst {dimension_numbers = #tpu.dot_dimension_numbers<[1], [0], [0], [1], [0, 0, 1, 1], [], []>} : vector<8x4xf32>, vector<4x256xf32>, vector<8x256xf32> -> vector<8x256xf32>
    %c16_i32 = arith.constant 16 : i32
    %9 = tpu.dynamic_rotate %1 by %c16_i32 dim 1 : vector<4x256xf32>, i32 -> vector<4x256xf32>
    %c1 = arith.constant 1 : index
    %c0_7 = arith.constant 0 : index
    %10 = vector.load %arg6[%c1, %c0_7] : memref<9x256xf32, #tpu.memory_space<vmem>>, vector<1x256xf32>
    %11 = vector.broadcast %10 : vector<1x256xf32> to vector<4x256xf32>
    %12 = arith.mulf %9, %11 : vector<4x256xf32>
    %c1_8 = arith.constant 1 : index
    %c0_9 = arith.constant 0 : index
    %c0_10 = arith.constant 0 : index
    %13 = vector.load %arg2[%c1_8, %c0_9, %c0_10] : memref<9x8x4xf32, #tpu.memory_space<vmem>>, vector<1x8x4xf32>
    %14 = vector.shape_cast %13 : vector<1x8x4xf32> to vector<8x4xf32>
    %cst_11 = arith.constant dense<0.000000e+00> : vector<8x256xf32>
    %15 = tpu.matmul %14, %12, %cst_11 {dimension_numbers = #tpu.dot_dimension_numbers<[1], [0], [0], [1], [0, 0, 1, 1], [], []>} : vector<8x4xf32>, vector<4x256xf32>, vector<8x256xf32> -> vector<8x256xf32>
    %16 = arith.addf %8, %15 : vector<8x256xf32>
    %c15_i32 = arith.constant 15 : i32
    %17 = tpu.dynamic_rotate %1 by %c15_i32 dim 1 : vector<4x256xf32>, i32 -> vector<4x256xf32>
    %c2 = arith.constant 2 : index
    %c0_12 = arith.constant 0 : index
    %18 = vector.load %arg6[%c2, %c0_12] : memref<9x256xf32, #tpu.memory_space<vmem>>, vector<1x256xf32>
    %19 = vector.broadcast %18 : vector<1x256xf32> to vector<4x256xf32>
    %20 = arith.mulf %17, %19 : vector<4x256xf32>
    %c2_13 = arith.constant 2 : index
    %c0_14 = arith.constant 0 : index
    %c0_15 = arith.constant 0 : index
    %21 = vector.load %arg2[%c2_13, %c0_14, %c0_15] : memref<9x8x4xf32, #tpu.memory_space<vmem>>, vector<1x8x4xf32>
    %22 = vector.shape_cast %21 : vector<1x8x4xf32> to vector<8x4xf32>
    %cst_16 = arith.constant dense<0.000000e+00> : vector<8x256xf32>
    %23 = tpu.matmul %22, %20, %cst_16 {dimension_numbers = #tpu.dot_dimension_numbers<[1], [0], [0], [1], [0, 0, 1, 1], [], []>} : vector<8x4xf32>, vector<4x256xf32>, vector<8x256xf32> -> vector<8x256xf32>
    %24 = arith.addf %16, %23 : vector<8x256xf32>
    %c1_i32 = arith.constant 1 : i32
    %25 = tpu.dynamic_rotate %1 by %c1_i32 dim 1 : vector<4x256xf32>, i32 -> vector<4x256xf32>
    %c3 = arith.constant 3 : index
    %c0_17 = arith.constant 0 : index
    %26 = vector.load %arg6[%c3, %c0_17] : memref<9x256xf32, #tpu.memory_space<vmem>>, vector<1x256xf32>
    %27 = vector.broadcast %26 : vector<1x256xf32> to vector<4x256xf32>
    %28 = arith.mulf %25, %27 : vector<4x256xf32>
    %c3_18 = arith.constant 3 : index
    %c0_19 = arith.constant 0 : index
    %c0_20 = arith.constant 0 : index
    %29 = vector.load %arg2[%c3_18, %c0_19, %c0_20] : memref<9x8x4xf32, #tpu.memory_space<vmem>>, vector<1x8x4xf32>
    %30 = vector.shape_cast %29 : vector<1x8x4xf32> to vector<8x4xf32>
    %cst_21 = arith.constant dense<0.000000e+00> : vector<8x256xf32>
    %31 = tpu.matmul %30, %28, %cst_21 {dimension_numbers = #tpu.dot_dimension_numbers<[1], [0], [0], [1], [0, 0, 1, 1], [], []>} : vector<8x4xf32>, vector<4x256xf32>, vector<8x256xf32> -> vector<8x256xf32>
    %32 = arith.addf %24, %31 : vector<8x256xf32>
    %c4 = arith.constant 4 : index
    %c0_22 = arith.constant 0 : index
    %33 = vector.load %arg6[%c4, %c0_22] : memref<9x256xf32, #tpu.memory_space<vmem>>, vector<1x256xf32>
    %34 = vector.broadcast %33 : vector<1x256xf32> to vector<4x256xf32>
    %35 = arith.mulf %1, %34 : vector<4x256xf32>
    %c4_23 = arith.constant 4 : index
    %c0_24 = arith.constant 0 : index
    %c0_25 = arith.constant 0 : index
    %36 = vector.load %arg2[%c4_23, %c0_24, %c0_25] : memref<9x8x4xf32, #tpu.memory_space<vmem>>, vector<1x8x4xf32>
    %37 = vector.shape_cast %36 : vector<1x8x4xf32> to vector<8x4xf32>
    %cst_26 = arith.constant dense<0.000000e+00> : vector<8x256xf32>
    %38 = tpu.matmul %37, %35, %cst_26 {dimension_numbers = #tpu.dot_dimension_numbers<[1], [0], [0], [1], [0, 0, 1, 1], [], []>} : vector<8x4xf32>, vector<4x256xf32>, vector<8x256xf32> -> vector<8x256xf32>
    %39 = arith.addf %32, %38 : vector<8x256xf32>
    %c255_i32 = arith.constant 255 : i32
    %40 = tpu.dynamic_rotate %1 by %c255_i32 dim 1 : vector<4x256xf32>, i32 -> vector<4x256xf32>
    %c5 = arith.constant 5 : index
    %c0_27 = arith.constant 0 : index
    %41 = vector.load %arg6[%c5, %c0_27] : memref<9x256xf32, #tpu.memory_space<vmem>>, vector<1x256xf32>
    %42 = vector.broadcast %41 : vector<1x256xf32> to vector<4x256xf32>
    %43 = arith.mulf %40, %42 : vector<4x256xf32>
    %c5_28 = arith.constant 5 : index
    %c0_29 = arith.constant 0 : index
    %c0_30 = arith.constant 0 : index
    %44 = vector.load %arg2[%c5_28, %c0_29, %c0_30] : memref<9x8x4xf32, #tpu.memory_space<vmem>>, vector<1x8x4xf32>
    %45 = vector.shape_cast %44 : vector<1x8x4xf32> to vector<8x4xf32>
    %cst_31 = arith.constant dense<0.000000e+00> : vector<8x256xf32>
    %46 = tpu.matmul %45, %43, %cst_31 {dimension_numbers = #tpu.dot_dimension_numbers<[1], [0], [0], [1], [0, 0, 1, 1], [], []>} : vector<8x4xf32>, vector<4x256xf32>, vector<8x256xf32> -> vector<8x256xf32>
    %47 = arith.addf %39, %46 : vector<8x256xf32>
    %c241_i32 = arith.constant 241 : i32
    %48 = tpu.dynamic_rotate %1 by %c241_i32 dim 1 : vector<4x256xf32>, i32 -> vector<4x256xf32>
    %c6 = arith.constant 6 : index
    %c0_32 = arith.constant 0 : index
    %49 = vector.load %arg6[%c6, %c0_32] : memref<9x256xf32, #tpu.memory_space<vmem>>, vector<1x256xf32>
    %50 = vector.broadcast %49 : vector<1x256xf32> to vector<4x256xf32>
    %51 = arith.mulf %48, %50 : vector<4x256xf32>
    %c6_33 = arith.constant 6 : index
    %c0_34 = arith.constant 0 : index
    %c0_35 = arith.constant 0 : index
    %52 = vector.load %arg2[%c6_33, %c0_34, %c0_35] : memref<9x8x4xf32, #tpu.memory_space<vmem>>, vector<1x8x4xf32>
    %53 = vector.shape_cast %52 : vector<1x8x4xf32> to vector<8x4xf32>
    %cst_36 = arith.constant dense<0.000000e+00> : vector<8x256xf32>
    %54 = tpu.matmul %53, %51, %cst_36 {dimension_numbers = #tpu.dot_dimension_numbers<[1], [0], [0], [1], [0, 0, 1, 1], [], []>} : vector<8x4xf32>, vector<4x256xf32>, vector<8x256xf32> -> vector<8x256xf32>
    %55 = arith.addf %47, %54 : vector<8x256xf32>
    %c240_i32 = arith.constant 240 : i32
    %56 = tpu.dynamic_rotate %1 by %c240_i32 dim 1 : vector<4x256xf32>, i32 -> vector<4x256xf32>
    %c7 = arith.constant 7 : index
    %c0_37 = arith.constant 0 : index
    %57 = vector.load %arg6[%c7, %c0_37] : memref<9x256xf32, #tpu.memory_space<vmem>>, vector<1x256xf32>
    %58 = vector.broadcast %57 : vector<1x256xf32> to vector<4x256xf32>
    %59 = arith.mulf %56, %58 : vector<4x256xf32>
    %c7_38 = arith.constant 7 : index
    %c0_39 = arith.constant 0 : index
    %c0_40 = arith.constant 0 : index
    %60 = vector.load %arg2[%c7_38, %c0_39, %c0_40] : memref<9x8x4xf32, #tpu.memory_space<vmem>>, vector<1x8x4xf32>
    %61 = vector.shape_cast %60 : vector<1x8x4xf32> to vector<8x4xf32>
    %cst_41 = arith.constant dense<0.000000e+00> : vector<8x256xf32>
    %62 = tpu.matmul %61, %59, %cst_41 {dimension_numbers = #tpu.dot_dimension_numbers<[1], [0], [0], [1], [0, 0, 1, 1], [], []>} : vector<8x4xf32>, vector<4x256xf32>, vector<8x256xf32> -> vector<8x256xf32>
    %63 = arith.addf %55, %62 : vector<8x256xf32>
    %c239_i32 = arith.constant 239 : i32
    %64 = tpu.dynamic_rotate %1 by %c239_i32 dim 1 : vector<4x256xf32>, i32 -> vector<4x256xf32>
    %c8 = arith.constant 8 : index
    %c0_42 = arith.constant 0 : index
    %65 = vector.load %arg6[%c8, %c0_42] : memref<9x256xf32, #tpu.memory_space<vmem>>, vector<1x256xf32>
    %66 = vector.broadcast %65 : vector<1x256xf32> to vector<4x256xf32>
    %67 = arith.mulf %64, %66 : vector<4x256xf32>
    %c8_43 = arith.constant 8 : index
    %c0_44 = arith.constant 0 : index
    %c0_45 = arith.constant 0 : index
    %68 = vector.load %arg2[%c8_43, %c0_44, %c0_45] : memref<9x8x4xf32, #tpu.memory_space<vmem>>, vector<1x8x4xf32>
    %69 = vector.shape_cast %68 : vector<1x8x4xf32> to vector<8x4xf32>
    %cst_46 = arith.constant dense<0.000000e+00> : vector<8x256xf32>
    %70 = tpu.matmul %69, %67, %cst_46 {dimension_numbers = #tpu.dot_dimension_numbers<[1], [0], [0], [1], [0, 0, 1, 1], [], []>} : vector<8x4xf32>, vector<4x256xf32>, vector<8x256xf32> -> vector<8x256xf32>
    %71 = arith.addf %63, %70 : vector<8x256xf32>
    %c0_47 = arith.constant 0 : index
    %c0_48 = arith.constant 0 : index
    %72 = vector.load %arg3[%c0_47, %c0_48] : memref<8x1xf32, #tpu.memory_space<vmem>>, vector<8x1xf32>
    %73 = vector.broadcast %72 : vector<8x1xf32> to vector<8x256xf32>
    %74 = arith.addf %71, %73 : vector<8x256xf32>
    %cst_49 = arith.constant 0.000000e+00 : f32
    %75 = vector.broadcast %cst_49 : f32 to vector<8x256xf32>
    %76 = arith.maximumf %74, %75 : vector<8x256xf32>
    %c17_i32_50 = arith.constant 17 : i32
    %77 = tpu.dynamic_rotate %76 by %c17_i32_50 dim 1 : vector<8x256xf32>, i32 -> vector<8x256xf32>
    %c0_51 = arith.constant 0 : index
    %c0_52 = arith.constant 0 : index
    %78 = vector.load %arg6[%c0_51, %c0_52] : memref<9x256xf32, #tpu.memory_space<vmem>>, vector<1x256xf32>
    %79 = vector.broadcast %78 : vector<1x256xf32> to vector<8x256xf32>
    %80 = arith.mulf %77, %79 : vector<8x256xf32>
    %c0_53 = arith.constant 0 : index
    %c0_54 = arith.constant 0 : index
    %c0_55 = arith.constant 0 : index
    %81 = vector.load %arg4[%c0_53, %c0_54, %c0_55] : memref<9x8x8xf32, #tpu.memory_space<vmem>>, vector<1x8x8xf32>
    %82 = vector.shape_cast %81 : vector<1x8x8xf32> to vector<8x8xf32>
    %cst_56 = arith.constant dense<0.000000e+00> : vector<8x256xf32>
    %83 = tpu.matmul %82, %80, %cst_56 {dimension_numbers = #tpu.dot_dimension_numbers<[1], [0], [0], [1], [0, 0, 1, 1], [], []>} : vector<8x8xf32>, vector<8x256xf32>, vector<8x256xf32> -> vector<8x256xf32>
    %c16_i32_57 = arith.constant 16 : i32
    %84 = tpu.dynamic_rotate %76 by %c16_i32_57 dim 1 : vector<8x256xf32>, i32 -> vector<8x256xf32>
    %c1_58 = arith.constant 1 : index
    %c0_59 = arith.constant 0 : index
    %85 = vector.load %arg6[%c1_58, %c0_59] : memref<9x256xf32, #tpu.memory_space<vmem>>, vector<1x256xf32>
    %86 = vector.broadcast %85 : vector<1x256xf32> to vector<8x256xf32>
    %87 = arith.mulf %84, %86 : vector<8x256xf32>
    %c1_60 = arith.constant 1 : index
    %c0_61 = arith.constant 0 : index
    %c0_62 = arith.constant 0 : index
    %88 = vector.load %arg4[%c1_60, %c0_61, %c0_62] : memref<9x8x8xf32, #tpu.memory_space<vmem>>, vector<1x8x8xf32>
    %89 = vector.shape_cast %88 : vector<1x8x8xf32> to vector<8x8xf32>
    %cst_63 = arith.constant dense<0.000000e+00> : vector<8x256xf32>
    %90 = tpu.matmul %89, %87, %cst_63 {dimension_numbers = #tpu.dot_dimension_numbers<[1], [0], [0], [1], [0, 0, 1, 1], [], []>} : vector<8x8xf32>, vector<8x256xf32>, vector<8x256xf32> -> vector<8x256xf32>
    %91 = arith.addf %83, %90 : vector<8x256xf32>
    %c15_i32_64 = arith.constant 15 : i32
    %92 = tpu.dynamic_rotate %76 by %c15_i32_64 dim 1 : vector<8x256xf32>, i32 -> vector<8x256xf32>
    %c2_65 = arith.constant 2 : index
    %c0_66 = arith.constant 0 : index
    %93 = vector.load %arg6[%c2_65, %c0_66] : memref<9x256xf32, #tpu.memory_space<vmem>>, vector<1x256xf32>
    %94 = vector.broadcast %93 : vector<1x256xf32> to vector<8x256xf32>
    %95 = arith.mulf %92, %94 : vector<8x256xf32>
    %c2_67 = arith.constant 2 : index
    %c0_68 = arith.constant 0 : index
    %c0_69 = arith.constant 0 : index
    %96 = vector.load %arg4[%c2_67, %c0_68, %c0_69] : memref<9x8x8xf32, #tpu.memory_space<vmem>>, vector<1x8x8xf32>
    %97 = vector.shape_cast %96 : vector<1x8x8xf32> to vector<8x8xf32>
    %cst_70 = arith.constant dense<0.000000e+00> : vector<8x256xf32>
    %98 = tpu.matmul %97, %95, %cst_70 {dimension_numbers = #tpu.dot_dimension_numbers<[1], [0], [0], [1], [0, 0, 1, 1], [], []>} : vector<8x8xf32>, vector<8x256xf32>, vector<8x256xf32> -> vector<8x256xf32>
    %99 = arith.addf %91, %98 : vector<8x256xf32>
    %c1_i32_71 = arith.constant 1 : i32
    %100 = tpu.dynamic_rotate %76 by %c1_i32_71 dim 1 : vector<8x256xf32>, i32 -> vector<8x256xf32>
    %c3_72 = arith.constant 3 : index
    %c0_73 = arith.constant 0 : index
    %101 = vector.load %arg6[%c3_72, %c0_73] : memref<9x256xf32, #tpu.memory_space<vmem>>, vector<1x256xf32>
    %102 = vector.broadcast %101 : vector<1x256xf32> to vector<8x256xf32>
    %103 = arith.mulf %100, %102 : vector<8x256xf32>
    %c3_74 = arith.constant 3 : index
    %c0_75 = arith.constant 0 : index
    %c0_76 = arith.constant 0 : index
    %104 = vector.load %arg4[%c3_74, %c0_75, %c0_76] : memref<9x8x8xf32, #tpu.memory_space<vmem>>, vector<1x8x8xf32>
    %105 = vector.shape_cast %104 : vector<1x8x8xf32> to vector<8x8xf32>
    %cst_77 = arith.constant dense<0.000000e+00> : vector<8x256xf32>
    %106 = tpu.matmul %105, %103, %cst_77 {dimension_numbers = #tpu.dot_dimension_numbers<[1], [0], [0], [1], [0, 0, 1, 1], [], []>} : vector<8x8xf32>, vector<8x256xf32>, vector<8x256xf32> -> vector<8x256xf32>
    %107 = arith.addf %99, %106 : vector<8x256xf32>
    %c4_78 = arith.constant 4 : index
    %c0_79 = arith.constant 0 : index
    %108 = vector.load %arg6[%c4_78, %c0_79] : memref<9x256xf32, #tpu.memory_space<vmem>>, vector<1x256xf32>
    %109 = vector.broadcast %108 : vector<1x256xf32> to vector<8x256xf32>
    %110 = arith.mulf %76, %109 : vector<8x256xf32>
    %c4_80 = arith.constant 4 : index
    %c0_81 = arith.constant 0 : index
    %c0_82 = arith.constant 0 : index
    %111 = vector.load %arg4[%c4_80, %c0_81, %c0_82] : memref<9x8x8xf32, #tpu.memory_space<vmem>>, vector<1x8x8xf32>
    %112 = vector.shape_cast %111 : vector<1x8x8xf32> to vector<8x8xf32>
    %cst_83 = arith.constant dense<0.000000e+00> : vector<8x256xf32>
    %113 = tpu.matmul %112, %110, %cst_83 {dimension_numbers = #tpu.dot_dimension_numbers<[1], [0], [0], [1], [0, 0, 1, 1], [], []>} : vector<8x8xf32>, vector<8x256xf32>, vector<8x256xf32> -> vector<8x256xf32>
    %114 = arith.addf %107, %113 : vector<8x256xf32>
    %c255_i32_84 = arith.constant 255 : i32
    %115 = tpu.dynamic_rotate %76 by %c255_i32_84 dim 1 : vector<8x256xf32>, i32 -> vector<8x256xf32>
    %c5_85 = arith.constant 5 : index
    %c0_86 = arith.constant 0 : index
    %116 = vector.load %arg6[%c5_85, %c0_86] : memref<9x256xf32, #tpu.memory_space<vmem>>, vector<1x256xf32>
    %117 = vector.broadcast %116 : vector<1x256xf32> to vector<8x256xf32>
    %118 = arith.mulf %115, %117 : vector<8x256xf32>
    %c5_87 = arith.constant 5 : index
    %c0_88 = arith.constant 0 : index
    %c0_89 = arith.constant 0 : index
    %119 = vector.load %arg4[%c5_87, %c0_88, %c0_89] : memref<9x8x8xf32, #tpu.memory_space<vmem>>, vector<1x8x8xf32>
    %120 = vector.shape_cast %119 : vector<1x8x8xf32> to vector<8x8xf32>
    %cst_90 = arith.constant dense<0.000000e+00> : vector<8x256xf32>
    %121 = tpu.matmul %120, %118, %cst_90 {dimension_numbers = #tpu.dot_dimension_numbers<[1], [0], [0], [1], [0, 0, 1, 1], [], []>} : vector<8x8xf32>, vector<8x256xf32>, vector<8x256xf32> -> vector<8x256xf32>
    %122 = arith.addf %114, %121 : vector<8x256xf32>
    %c241_i32_91 = arith.constant 241 : i32
    %123 = tpu.dynamic_rotate %76 by %c241_i32_91 dim 1 : vector<8x256xf32>, i32 -> vector<8x256xf32>
    %c6_92 = arith.constant 6 : index
    %c0_93 = arith.constant 0 : index
    %124 = vector.load %arg6[%c6_92, %c0_93] : memref<9x256xf32, #tpu.memory_space<vmem>>, vector<1x256xf32>
    %125 = vector.broadcast %124 : vector<1x256xf32> to vector<8x256xf32>
    %126 = arith.mulf %123, %125 : vector<8x256xf32>
    %c6_94 = arith.constant 6 : index
    %c0_95 = arith.constant 0 : index
    %c0_96 = arith.constant 0 : index
    %127 = vector.load %arg4[%c6_94, %c0_95, %c0_96] : memref<9x8x8xf32, #tpu.memory_space<vmem>>, vector<1x8x8xf32>
    %128 = vector.shape_cast %127 : vector<1x8x8xf32> to vector<8x8xf32>
    %cst_97 = arith.constant dense<0.000000e+00> : vector<8x256xf32>
    %129 = tpu.matmul %128, %126, %cst_97 {dimension_numbers = #tpu.dot_dimension_numbers<[1], [0], [0], [1], [0, 0, 1, 1], [], []>} : vector<8x8xf32>, vector<8x256xf32>, vector<8x256xf32> -> vector<8x256xf32>
    %130 = arith.addf %122, %129 : vector<8x256xf32>
    %c240_i32_98 = arith.constant 240 : i32
    %131 = tpu.dynamic_rotate %76 by %c240_i32_98 dim 1 : vector<8x256xf32>, i32 -> vector<8x256xf32>
    %c7_99 = arith.constant 7 : index
    %c0_100 = arith.constant 0 : index
    %132 = vector.load %arg6[%c7_99, %c0_100] : memref<9x256xf32, #tpu.memory_space<vmem>>, vector<1x256xf32>
    %133 = vector.broadcast %132 : vector<1x256xf32> to vector<8x256xf32>
    %134 = arith.mulf %131, %133 : vector<8x256xf32>
    %c7_101 = arith.constant 7 : index
    %c0_102 = arith.constant 0 : index
    %c0_103 = arith.constant 0 : index
    %135 = vector.load %arg4[%c7_101, %c0_102, %c0_103] : memref<9x8x8xf32, #tpu.memory_space<vmem>>, vector<1x8x8xf32>
    %136 = vector.shape_cast %135 : vector<1x8x8xf32> to vector<8x8xf32>
    %cst_104 = arith.constant dense<0.000000e+00> : vector<8x256xf32>
    %137 = tpu.matmul %136, %134, %cst_104 {dimension_numbers = #tpu.dot_dimension_numbers<[1], [0], [0], [1], [0, 0, 1, 1], [], []>} : vector<8x8xf32>, vector<8x256xf32>, vector<8x256xf32> -> vector<8x256xf32>
    %138 = arith.addf %130, %137 : vector<8x256xf32>
    %c239_i32_105 = arith.constant 239 : i32
    %139 = tpu.dynamic_rotate %76 by %c239_i32_105 dim 1 : vector<8x256xf32>, i32 -> vector<8x256xf32>
    %c8_106 = arith.constant 8 : index
    %c0_107 = arith.constant 0 : index
    %140 = vector.load %arg6[%c8_106, %c0_107] : memref<9x256xf32, #tpu.memory_space<vmem>>, vector<1x256xf32>
    %141 = vector.broadcast %140 : vector<1x256xf32> to vector<8x256xf32>
    %142 = arith.mulf %139, %141 : vector<8x256xf32>
    %c8_108 = arith.constant 8 : index
    %c0_109 = arith.constant 0 : index
    %c0_110 = arith.constant 0 : index
    %143 = vector.load %arg4[%c8_108, %c0_109, %c0_110] : memref<9x8x8xf32, #tpu.memory_space<vmem>>, vector<1x8x8xf32>
    %144 = vector.shape_cast %143 : vector<1x8x8xf32> to vector<8x8xf32>
    %cst_111 = arith.constant dense<0.000000e+00> : vector<8x256xf32>
    %145 = tpu.matmul %144, %142, %cst_111 {dimension_numbers = #tpu.dot_dimension_numbers<[1], [0], [0], [1], [0, 0, 1, 1], [], []>} : vector<8x8xf32>, vector<8x256xf32>, vector<8x256xf32> -> vector<8x256xf32>
    %146 = arith.addf %138, %145 : vector<8x256xf32>
    %c0_112 = arith.constant 0 : index
    %c0_113 = arith.constant 0 : index
    %147 = vector.load %arg5[%c0_112, %c0_113] : memref<8x1xf32, #tpu.memory_space<vmem>>, vector<8x1xf32>
    %148 = vector.broadcast %147 : vector<8x1xf32> to vector<8x256xf32>
    %149 = arith.addf %146, %148 : vector<8x256xf32>
    %cst_114 = arith.constant 0.000000e+00 : f32
    %150 = vector.broadcast %cst_114 : f32 to vector<8x256xf32>
    %151 = arith.maximumf %149, %150 : vector<8x256xf32>
    %c0_115 = arith.constant 0 : index
    %c0_116 = arith.constant 0 : index
    %c0_117 = arith.constant 0 : index
    %152 = vector.load %arg7[%c0_115, %c0_116, %c0_117] : memref<1x8x256xf32, #tpu.memory_space<vmem>>, vector<1x8x256xf32>
    %153 = vector.shape_cast %152 : vector<1x8x256xf32> to vector<8x256xf32>
    %154 = vector.shape_cast %151 : vector<8x256xf32> to vector<1x8x256xf32>
    tpu.vector_store %arg7[%c0_115, %c0_116, %c0_117], %154 {strides = array<i32>} : memref<1x8x256xf32, #tpu.memory_space<vmem>>, vector<1x8x256xf32>,
    return
  }
  func.func @transform_0(%arg0: i32) -> (i32, i32, i32) {
    %c0_i32 = arith.constant 0 : i32
    %c0_i32_0 = arith.constant 0 : i32
    %c0_i32_1 = arith.constant 0 : i32
    return %arg0, %c0_i32, %c0_i32_0 : i32, i32, i32
  }
  func.func @transform_1(%arg0: i32) -> (i32, i32, i32) {
    %c0_i32 = arith.constant 0 : i32
    %c0_i32_0 = arith.constant 0 : i32
    %c0_i32_1 = arith.constant 0 : i32
    %c0_i32_2 = arith.constant 0 : i32
    return %c0_i32, %c0_i32_0, %c0_i32_1 : i32, i32, i32
  }
  func.func @transform_2(%arg0: i32) -> (i32, i32) {
    %c0_i32 = arith.constant 0 : i32
    %c0_i32_0 = arith.constant 0 : i32
    %c0_i32_1 = arith.constant 0 : i32
    return %c0_i32, %c0_i32_0 : i32, i32
  }
  func.func @transform_3(%arg0: i32) -> (i32, i32, i32) {
    %c0_i32 = arith.constant 0 : i32
    %c0_i32_0 = arith.constant 0 : i32
    %c0_i32_1 = arith.constant 0 : i32
    %c0_i32_2 = arith.constant 0 : i32
    return %c0_i32, %c0_i32_0, %c0_i32_1 : i32, i32, i32
  }
  func.func @transform_4(%arg0: i32) -> (i32, i32) {
    %c0_i32 = arith.constant 0 : i32
    %c0_i32_0 = arith.constant 0 : i32
    %c0_i32_1 = arith.constant 0 : i32
    return %c0_i32, %c0_i32_0 : i32, i32
  }
  func.func @transform_5(%arg0: i32) -> (i32, i32) {
    %c0_i32 = arith.constant 0 : i32
    %c0_i32_0 = arith.constant 0 : i32
    %c0_i32_1 = arith.constant 0 : i32
    return %c0_i32, %c0_i32_0 : i32, i32
  }
  func.func @transform_6(%arg0: i32) -> (i32, i32, i32) {
    %c0_i32 = arith.constant 0 : i32
    %c0_i32_0 = arith.constant 0 : i32
    %c0_i32_1 = arith.constant 0 : i32
    return %arg0, %c0_i32, %c0_i32_0 : i32, i32, i32
  }
}

</mosaic_0001>

<bundles_post_ra>
// kernel: tpu_custom_call.1
= control target key start
LH: loop header
LB: loop body
LE: loop exit
PB: predicated region body
PF: predicated region fallthrough
CT: control target
= control target key end

     0   :  { %11 = vsyncpa [#allocation3], 0  ;;  %s2734_s0 = inlined_call_operand.vmem [shape: f32[2,4,256], index: 0, kind: input, shape index: {}]   ;;  %s2735_s1 = inlined_call_operand.vmem [shape: f32[9,8,4], index: 1, kind: input, shape index: {}]   ;;  %s2736_s2 = inlined_call_operand.vmem [shape: f32[8,1], index: 2, kind: input, shape index: {}]   ;;  %s2737_s3 = inlined_call_operand.vmem [shape: f32[9,8,8], index: 3, kind: input, shape index: {}]   ;;  %s2738_s4 = inlined_call_operand.vmem [shape: f32[8,1], index: 4, kind: input, shape index: {}]   ;;  %s2739_s5 = inlined_call_operand.vmem [shape: f32[9,256], index: 5, kind: input, shape index: {}]   ;;  %s2740_s6 = inlined_call_operand.hbm [shape: f32[2,8,256], index: 6, kind: output, shape index: {}]  }
   0x1   :  { %13 = vsyncpa [#allocation3 + $0x1], 0  ;;  %s2293_s21 = smov 0   ;;  %s2295_s22 = smov 0  }
   0x2   :  { %s2297_s23 = smov 0   ;;  %s2299_s24 = smov 0  }
   0x3 LB: > { %s2314_s25 = sadd.s32 4294967295, %s2245_s24   ;;  %s2060_s26 = sadd.s32 4294967294, %s2245_s24   ;;  %s2245_s24 = sphi %s2299_s24, %s2746_s24   ;;  %s2241_s23 = sphi %s2297_s23, %s2745_s23   ;;  %s2237_s22 = sphi %s2295_s22, %s2744_s22   ;;  %s2233_s21 = sphi %s2293_s21, %s2743_s21  }
   0x4   : > { %s2318_s27 = sadd.s32 1, %s2245_s24   ;;  %s157_s28 = sadd.s32 1, %s2241_s23 }
   0x5   : > { %s154_s29 = ssub.s32 %s2245_s24, %s2318_s27  ;;  %p167_p0 = scmp.ne.s32.totalorder %s2241_s23, %s2237_s22 }
   0x6   : > { %p155_p1 = scmp.eq.s32.totalorder %s154_s29, 0  ;;  %p168_p2 = scmp.eq.s32.totalorder %s2314_s25, 1 }
   0x7   : > { %p173_p3 = scmp.ne.s32.totalorder %s2237_s22, %s2233_s21  ;;  %p174_p4 = scmp.eq.s32.totalorder %s2060_s26, 1 }
   0x8   : > { %s2329_s30 = scalar_select %p155_p1, %s2241_s23, %s157_s28  }
   0x9   : > { %p2331_p5 = por %p168_p2, %p167_p0  ;;  %p2335_p6 = por %p174_p4, %p173_p3 }
   0xa   : > { %p2063_p7 = scmp.ge.s32.totalorder %s2245_s24, 1  ;;  %p215_p8 = scmp.lt.s32.totalorder %s2245_s24, 3 }
   0xc   : > { %p216_p9 = pnand %p2063_p7, %p215_p8 }
   0xd   : > { %p245_p10 = scmp.lt.s32.totalorder (!%p216_p9), %s2314_s25, 1  ;;  %s2247_s14 = smov (!%p216_p9), 17  }
   0xe   : > { %219 = sbr.rel (%p216_p9) target bundleno = 737 (0x2e1), region = 44  ;;  %s2248_s15 = smov (!%p216_p9), 16  }
   0xf   : > { %s2250_s16 = smov (!%p216_p9), 15   ;;  %s2251_s17 = smov (!%p216_p9), 1  }
  0x10   : > { %s2252_s18 = smov (!%p216_p9), 127   ;;  %s2253_s19 = smov (!%p216_p9), 113  }
  0x11   : > { %s2255_s20 = smov (!%p216_p9), 112   ;;  %s2256_s26 = smov (!%p216_p9), 111  }
  0x13   : > { %s246_s9 = scalar_select %p245_p10, %s2314_s25, 1  ;;  %v2249_v2 = vmov 0.0   ;;  %v2254_v3 = vmov 0   ;;  %v1198_v4 = vld [vmem:[%s2736_s2] sm:$0xff]  ;;  %v258_v5 = vlaneseq  ;;  %vm306_vm1 = vcmask 1043456   ;;  %v2068_v45 = vld [vmem:[%s2735_s1 + $0x8] sm:$0xff] }
  0x14   : > { %377 = vmatprep.mubr.f32.mxu0 %v2249_v2  ;;  %457 = vmatprep.mubr.f32.mxu1 %v2249_v2  ;;  %v2085_v7 = vld [vmem:[%s2739_s5 + $0x4] ss:$8 sm:$0x3]  ;;  %v263_v11 = vld [vmem:[%s2739_s5] ss:$8 sm:$0x3] }
  0x15   : > { %s2132_s10 = sshll.u32 %s246_s9, 3  ;;  %2183 = vset.pattern.permute.xlu0 %v2254_v3  ;;  %v266_v6 = vshrl.u32 %v258_v5, 7  ;;  %v2382_v8 = vand.u32 127, %v258_v5  ;;  %v2067_v18 = vld [vmem:[%s2739_s5 + $0x1] ss:$8 sm:$0x3] }
  0x16   : > { %s249_s13 = scalar_lea.vmem %s2734_s0, %s2132_s10  ;;  %v2075_v21 = vld [vmem:[%s2739_s5 + $0x2] ss:$8 sm:$0x3]  ;;  %v2080_v25 = vld [vmem:[%s2739_s5 + $0x3] ss:$8 sm:$0x3] }
  0x17   : > { %v2346_v0 = vld [vmem:[%s249_s13] sm:$0xff]  ;;  %v2384_v9 = vsub.s32 0, %v266_v6  ;;  %v2386_v10 = vsub.s32 1, %v266_v6  ;;  %vm260_vm0 = vcmp.lt.s32.totalorder %v2382_v8, 17  ;;  %vm468_vm2 = vcmp.lt.s32.totalorder %v2382_v8, 15  ;;  %v2076_v58 = vld [vmem:[%s2735_s1 + $0x10] sm:$0xff] }
  0x18   : > { %254 = vrot.lane.b32.xlu1 %v2346_v0, %s2247_s14  ;;  %278 = vrot.lane.b32.xlu0 %v2346_v0, %s2248_s15  ;;  %v252_v1 = vcombine.high %v2346_v0, %v2346_v0  ;;  %vm282_vm3 = vcmp.lt.s32.totalorder %v2382_v8, 16  ;;  %vm574_vm4 = vcmp.lt.s32.totalorder %v2382_v8, 1  ;;  %v277_v30 = vld [vmem:[%s2735_s1] sm:$0xff]  ;;  %vm302_vm5 = vcmask 31744   ;;  %v2081_v59 = vld [vmem:[%s2735_s1 + $0x18] sm:$0xff] }
  0x19   : > { %v2392_v14 = vrot.slane %v2085_v7, %v2384_v9  ;;  %v2395_v15 = vrot.slane %v2085_v7, %v2386_v10  ;;  %v2399_v16 = vrot.slane %v263_v11, %v2384_v9  ;;  %v2402_v17 = vrot.slane %v263_v11, %v2386_v10  ;;  %v2090_v44 = vld [vmem:[%s2739_s5 + $0x5] ss:$8 sm:$0x3]  ;;  %v2095_v57 = vld [vmem:[%s2739_s5 + $0x6] ss:$8 sm:$0x3] }
  0x1a   : > { %v2424_v28 = vrot.slane %v2067_v18, %v2384_v9  ;;  %v2427_v29 = vrot.slane %v2067_v18, %v2386_v10  ;;  %v2435_v31 = vrot.slane %v2075_v21, %v2384_v9  ;;  %v2438_v32 = vrot.slane %v2075_v21, %v2386_v10  ;;  %v2100_v5 = vld [vmem:[%s2739_s5 + $0x7] ss:$8 sm:$0x3] }
  0x1b   : > { %v687_v22 = vcombine.low %v2392_v14, %v2395_v15  ;;  %v2441_v35 = vrot.slane %v2080_v25, %v2384_v9  ;;  %v2456_v43 = vrot.slane %v2080_v25, %v2386_v10  ;;  %v2475_v53 = vrot.slane %v2090_v44, %v2384_v9  ;;  %v2086_v6 = vld [vmem:[%s2735_s1 + $0x20] sm:$0xff]  ;;  %v2091_v7 = vld [vmem:[%s2735_s1 + $0x28] sm:$0xff] }
  0x1c   : > { %464 = vrot.lane.b32.xlu0 %v2346_v0, %s2250_s16  ;;  %256 = vrot.lane.b32.xlu1 %v252_v1, %s2247_s14  ;;  %vm778_vm6 = vcmp.lt.s32.totalorder %v2382_v8, 127  ;;  %v2483_v56 = vrot.slane %v2090_v44, %v2386_v10  ;;  %vm884_vm7 = vcmp.lt.s32.totalorder %v2382_v8, 113  ;;  %vm990_vm8 = vcmp.lt.s32.totalorder %v2382_v8, 112  ;;  %v2106_v44 = vld [vmem:[%s2735_s1 + $0x40] sm:$0xff] }
  0x1d   : > { %v689_v36 = vmul.f32 %v687_v22, %v2346_v0  ;;  %v2541_v22 = vrot.slane %v2100_v5, %v2386_v10  ;;  %vm1096_vm9 = vcmp.lt.s32.totalorder %v2382_v8, 111  ;;  %vm1227_vm10 = vcmask 64512  }
  0x1f   : > { %v693_v49 = vcombine.high %v689_v36, %v689_v36 }
  0x20   : > { %466 = vrot.lane.b32.xlu1 %v252_v1, %s2250_s16  ;;  %280 = vrot.lane.b32.xlu0 %v252_v1, %s2248_s15 }
  0x24   : > { %572 = vrot.lane.b32.xlu1 %v252_v1, %s2251_s17  ;;  %570 = vrot.lane.b32.xlu0 %v2346_v0, %s2251_s17 }
  0x28   : > { %776 = vrot.lane.b32.xlu1 %v252_v1, %s2252_s18  ;;  %774 = vrot.lane.b32.xlu0 %v2346_v0, %s2252_s18 }
  0x2c   : > { %882 = vrot.lane.b32.xlu1 %v252_v1, %s2253_s19  ;;  %880 = vrot.lane.b32.xlu0 %v2346_v0, %s2253_s19 }
  0x30   : > { %988 = vrot.lane.b32.xlu1 %v252_v1, %s2255_s20  ;;  %986 = vrot.lane.b32.xlu0 %v2346_v0, %s2255_s20 }
  0x34   : > { %1094 = vrot.lane.b32.xlu1 %v252_v1, %s2256_s26  ;;  %1092 = vrot.lane.b32.xlu0 %v2346_v0, %s2256_s26  ;;  %v2504_v0 = vrot.slane %v2095_v57, %v2384_v9 }
  0x38   : > { %1201 = vperm.xlu0 %2183, %v1198_v4   ;;  %v2512_v4 = vrot.slane %v2095_v57, %v2386_v10 }
  0x8a   : > { %v255_v12 = vpop.permute.xlu1 %254  ;;  %v279_v13 = vpop.permute.xlu0 %278 }
  0x8e   : > { %v465_v19 = vpop.permute.xlu0 %464  ;;  %v257_v20 = vpop.permute.xlu1 %256 }
  0x8f   : > { %v261_v23 = vsel %vm260_vm0, %v255_v12, %v257_v20  ;;  %v262_v24 = vsel %vm260_vm0, %v257_v20, %v255_v12 }
  0x90   : > { %v275_v26 = vmul.f32 %v2399_v16, %v262_v24  ;;  %v276_v27 = vmul.f32 %v2402_v17, %v261_v23  ;;  %v2096_v23 = vld [vmem:[%s2735_s1 + $0x30] sm:$0xff] }
  0x91   : > { %v2105_v24 = vld [vmem:[%s2739_s5 + $0x10] ss:$8 sm:$0x3] }
  0x92   : > { %2072 = vmatprep.subr.msk.mxu1 %vm306_vm1, %v276_v27  ;;  %v467_v33 = vpop.permute.xlu1 %466  ;;  %v281_v34 = vpop.permute.xlu0 %280 }
  0x93   : > { %v469_v37 = vsel %vm468_vm2, %v465_v19, %v467_v33  ;;  %v283_v38 = vsel %vm282_vm3, %v279_v13, %v281_v34  ;;  %v284_v39 = vsel %vm282_vm3, %v281_v34, %v279_v13  ;;  %2073 = vmatpush1.msk.msra.mxu1 %vm306_vm1, %v275_v26  ;;  %v470_v40 = vsel %vm468_vm2, %v467_v33, %v465_v19 }
  0x94   : > { %v298_v41 = vmul.f32 %v2424_v28, %v284_v39  ;;  %v299_v42 = vmul.f32 %v2427_v29, %v283_v38  ;;  %2074 = vmatmul.mubr.msk.f32.vlgmr.msra.gmra.mxu1 %vm302_vm5, %v277_v30  ;;  %v485_v46 = vmul.f32 %v2438_v32, %v469_v37  ;;  %v484_v50 = vmul.f32 %v2435_v31, %v470_v40  ;;  %v2101_v38 = vld [vmem:[%s2735_s1 + $0x38] sm:$0xff] }
  0x95   : > { %667 = vmatprep.mubr.f32.mxu1 %v2249_v2  ;;  %v2533_v19 = vrot.slane %v2100_v5, %v2384_v9  ;;  %v2565_v37 = vrot.slane %v2105_v24, %v2386_v10 }
  0x96   : > { %v573_v47 = vpop.permute.xlu1 %572  ;;  %2069 = vmatprep.subr.msk.mxu0 %vm306_vm1, %v299_v42  ;;  %v571_v48 = vpop.permute.xlu0 %570 }
  0x97   : > { %v575_v51 = vsel %vm574_vm4, %v571_v48, %v573_v47  ;;  %v576_v52 = vsel %vm574_vm4, %v573_v47, %v571_v48  ;;  %2070 = vmatpush1.msk.msra.mxu0 %vm306_vm1, %v298_v41 }
  0x98   : > { %v590_v54 = vmul.f32 %v2441_v35, %v576_v52  ;;  %v591_v55 = vmul.f32 %v2456_v43, %v575_v51  ;;  %2071 = vmatmul.mubr.msk.f32.vlgmr.msra.gmra.mxu0 %vm302_vm5, %v2068_v45  ;;  %2077 = vmatprep.subr.msk.mxu0 %vm306_vm1, %v485_v46 }
  0x99   : > { %2078 = vmatpush1.msk.msra.mxu0 %vm306_vm1, %v484_v50  ;;  %561 = vmatprep.mubr.f32.mxu0 %v2249_v2 }
  0x9a   : > { %v777_v60 = vpop.permute.xlu1 %776  ;;  %2082 = vmatprep.subr.msk.mxu1 %vm306_vm1, %v591_v55  ;;  %v775_v61 = vpop.permute.xlu0 %774  ;;  %2087 = vmatprep.subr.msk.mxu0 %vm306_vm1, %v693_v49 }
  0x9b   : > { %v779_v62 = vsel %vm778_vm6, %v775_v61, %v777_v60  ;;  %v780_v63 = vsel %vm778_vm6, %v777_v60, %v775_v61  ;;  %2083 = vmatpush1.msk.msra.mxu1 %vm306_vm1, %v590_v54 }
  0x9c   : > { %v794_v1 = vmul.f32 %v2475_v53, %v779_v62  ;;  %v795_v3 = vmul.f32 %v2483_v56, %v780_v63  ;;  %2079 = vmatmul.mubr.msk.f32.vlgmr.msra.gmra.mxu0 %vm302_vm5, %v2076_v58  ;;  %2084 = vmatmul.mubr.msk.f32.vlgmr.msra.gmra.mxu1 %vm302_vm5, %v2081_v59 }
  0x9d   : > { %2088 = vmatpush1.msk.msra.mxu0 %vm306_vm1, %v689_v36  ;;  %765 = vmatprep.mubr.f32.mxu0 %v2249_v2  ;;  %v2562_v36 = vrot.slane %v2105_v24, %v2384_v9 }
  0x9e   : > { %v883_v11 = vpop.permute.xlu1 %882  ;;  %2092 = vmatprep.subr.msk.mxu1 %vm306_vm1, %v795_v3  ;;  %v881_v12 = vpop.permute.xlu0 %880  ;;  %871 = vmatprep.mubr.f32.mxu1 %v2249_v2 }
  0x9f   : > { %v885_v13 = vsel %vm884_vm7, %v881_v12, %v883_v11  ;;  %v886_v18 = vsel %vm884_vm7, %v883_v11, %v881_v12  ;;  %2093 = vmatpush1.msk.msra.mxu1 %vm306_vm1, %v794_v1 }
  0xa0   : > { %v900_v20 = vmul.f32 %v2504_v0, %v885_v13  ;;  %v901_v21 = vmul.f32 %v2512_v4, %v886_v18  ;;  %2089 = vmatmul.mubr.msk.f32.vlgmr.msra.gmra.mxu0 %vm302_vm5, %v2086_v6  ;;  %2094 = vmatmul.mubr.msk.f32.vlgmr.msra.gmra.mxu1 %vm302_vm5, %v2091_v7 }
  0xa1   : > { %977 = vmatprep.mubr.f32.mxu0 %v2249_v2  ;;  %1083 = vmatprep.mubr.f32.mxu1 %v2249_v2 }
  0xa2   : > { %v989_v25 = vpop.permute.xlu1 %988  ;;  %2097 = vmatprep.subr.msk.mxu0 %vm306_vm1, %v901_v21  ;;  %v987_v26 = vpop.permute.xlu0 %986 }
  0xa3   : > { %v991_v27 = vsel %vm990_vm8, %v987_v26, %v989_v25  ;;  %v992_v30 = vsel %vm990_vm8, %v989_v25, %v987_v26  ;;  %2098 = vmatpush1.msk.msra.mxu0 %vm306_vm1, %v900_v20 }
  0xa4   : > { %v1006_v33 = vmul.f32 %v2533_v19, %v991_v27  ;;  %v1007_v34 = vmul.f32 %v2541_v22, %v992_v30  ;;  %2099 = vmatmul.mubr.msk.f32.vlgmr.msra.gmra.mxu0 %vm302_vm5, %v2096_v23 }
  0xa5   : > { %1189 = vmatprep.mubr.f32.mxu0 %v2249_v2 }
  0xa6   : > { %v1095_v39 = vpop.permute.xlu1 %1094  ;;  %2102 = vmatprep.subr.msk.mxu1 %vm306_vm1, %v1007_v34  ;;  %v1093_v40 = vpop.permute.xlu0 %1092 }
  0xa7   : > { %v1097_v41 = vsel %vm1096_vm9, %v1093_v40, %v1095_v39  ;;  %v1098_v9 = vsel %vm1096_vm9, %v1095_v39, %v1093_v40  ;;  %2103 = vmatpush1.msk.msra.mxu1 %vm306_vm1, %v1006_v33 }
  0xa8   : > { %v1112_v10 = vmul.f32 %v2562_v36, %v1097_v41  ;;  %v1113_v42 = vmul.f32 %v2565_v37, %v1098_v9  ;;  %2104 = vmatmul.mubr.msk.f32.vlgmr.msra.gmra.mxu1 %vm302_vm5, %v2101_v38  ;;  %v1974_v41 = vld [vmem:[%s2738_s4] sm:$0xff] }
  0xa9   : > { %1295 = vmatprep.mubr.f32.mxu1 %v2249_v2 }
  0xaa   : > { %2107 = vmatprep.subr.msk.mxu0 %vm306_vm1, %v1113_v42 }
  0xab   : > { %2108 = vmatpush1.msk.msra.mxu0 %vm306_vm1, %v1112_v10 }
  0xac   : > { %2109 = vmatmul.mubr.msk.f32.vlgmr.msra.gmra.mxu0 %vm302_vm5, %v2106_v44 }
  0xad   : > { %1369 = vmatprep.mubr.f32.mxu0 %v2249_v2 }
  0xb3   : > { %v1202_v25 = vpop.permute.xlu0 %1201 }
 0x154   : > { %v459_v45 = vpop.f32.mrf.mxu1 }
 0x156   : > { %v461_v47 = vpop.f32.mrf.mxu1 }
 0x158   : > { %v379_v46 = vpop.f32.mrf.mxu0 }
 0x159   : > { %v460_v48 = vadd.f32 %v459_v45, %v379_v46 }
 0x15a   : > { %v381_v49 = vpop.f32.mrf.mxu0 }
 0x15b   : > { %v462_v50 = vadd.f32 %v461_v47, %v381_v49  ;;  %v2110_v49 = vld [vmem:[%s2737_s3 + $0x8] sm:$0xff] }
 0x15c   : > { %v563_v51 = vpop.f32.mrf.mxu0  ;;  %v669_v52 = vpop.f32.mrf.mxu1 }
 0x15d   : > { %v568_v54 = vadd.f32 %v563_v51, %v460_v48 }
 0x15e   : > { %v565_v55 = vpop.f32.mrf.mxu0  ;;  %v671_v57 = vpop.f32.mrf.mxu1 }
 0x15f   : > { %v569_v58 = vadd.f32 %v565_v55, %v462_v50  ;;  %v674_v59 = vadd.f32 %v669_v52, %v568_v54 }
 0x160   : > { %v767_v60 = vpop.f32.mrf.mxu0  ;;  %v873_v61 = vpop.f32.mrf.mxu1 }
 0x161   : > { %v675_v62 = vadd.f32 %v671_v57, %v569_v58  ;;  %v772_v63 = vadd.f32 %v767_v60, %v674_v59 }
 0x162   : > { %v769_v1 = vpop.f32.mrf.mxu0  ;;  %v875_v6 = vpop.f32.mrf.mxu1 }
 0x163   : > { %v773_v3 = vadd.f32 %v769_v1, %v675_v62  ;;  %v878_v5 = vadd.f32 %v873_v61, %v772_v63  ;;  %v2113_v61 = vld [vmem:[%s2737_s3 + $0x10] sm:$0xff] }
 0x164   : > { %v979_v7 = vpop.f32.mrf.mxu0 }
 0x165   : > { %v879_v11 = vadd.f32 %v875_v6, %v773_v3  ;;  %v984_v12 = vadd.f32 %v979_v7, %v878_v5  ;;  %v2117_v6 = vld [vmem:[%s2737_s3 + $0x20] sm:$0xff] }
 0x166   : > { %v981_v13 = vpop.f32.mrf.mxu0 }
 0x167   : > { %v985_v21 = vadd.f32 %v981_v13, %v879_v11  ;;  %v2119_v13 = vld [vmem:[%s2737_s3 + $0x28] sm:$0xff] }
 0x168   : > { %v1085_v18 = vpop.f32.mrf.mxu1 }
 0x169   : > { %v1090_v23 = vadd.f32 %v1085_v18, %v984_v12 }
 0x16a   : > { %v1087_v20 = vpop.f32.mrf.mxu1 }
 0x16b   : > { %v1091_v26 = vadd.f32 %v1087_v20, %v985_v21 }
 0x16c   : > { %v1191_v24 = vpop.f32.mrf.mxu0 }
 0x16d   : > { %v1196_v27 = vadd.f32 %v1191_v24, %v1090_v23  ;;  %v2121_v24 = vld [vmem:[%s2737_s3 + $0x30] sm:$0xff] }
 0x16e   : > { %v1193_v30 = vpop.f32.mrf.mxu0 }
 0x16f   : > { %v1197_v33 = vadd.f32 %v1193_v30, %v1091_v26  ;;  %v1204_v34 = vadd.f32 %v1202_v25, %v1196_v27  ;;  %v2123_v30 = vld [vmem:[%s2737_s3 + $0x38] sm:$0xff] }
 0x171   : > { %v1205_v38 = vadd.f32 %v1202_v25, %v1197_v33  ;;  %v1206_v39 = vmax.f32 %v1204_v34, 0.0 }
 0x173   : > { %1208 = vrot.lane.b32.xlu0 %v1206_v39, %s2247_s14  ;;  %1217 = vrot.lane.b32.xlu1 %v1206_v39, %s2248_s15  ;;  %v1207_v40 = vmax.f32 %v1205_v38, 0.0 }
 0x175   : > { %v1551_v63 = vmul.f32 %v1207_v40, %v2395_v15  ;;  %v2115_v15 = vld [vmem:[%s2737_s3 + $0x18] sm:$0xff] }
 0x177   : > { %1376 = vrot.lane.b32.xlu0 %v1206_v39, %s2250_s16  ;;  %1219 = vrot.lane.b32.xlu1 %v1207_v40, %s2248_s15  ;;  %s2257_s15 = smov [#allocation2]  }
 0x17b   : > { %1462 = vrot.lane.b32.xlu0 %v1206_v39, %s2251_s17  ;;  %1210 = vrot.lane.b32.xlu1 %v1207_v40, %s2247_s14 }
 0x17f   : > { %1630 = vrot.lane.b32.xlu0 %v1206_v39, %s2252_s18  ;;  %1378 = vrot.lane.b32.xlu1 %v1207_v40, %s2250_s16 }
 0x183   : > { %1716 = vrot.lane.b32.xlu0 %v1206_v39, %s2253_s19  ;;  %1464 = vrot.lane.b32.xlu1 %v1207_v40, %s2251_s17 }
 0x187   : > { %1802 = vrot.lane.b32.xlu0 %v1206_v39, %s2255_s20  ;;  %1632 = vrot.lane.b32.xlu1 %v1207_v40, %s2252_s18  ;;  %s242_s18 = sand.u32 1, %s2237_s22  }
 0x188   : > { %s1987_s29 = scalar_lea.sflag [#allocation3], %s242_s18 }
 0x18b   : > { %1888 = vrot.lane.b32.xlu0 %v1206_v39, %s2256_s26  ;;  %1718 = vrot.lane.b32.xlu1 %v1207_v40, %s2253_s19  ;;  %s2064_s19 = sshll.u32 %s242_s18, 4 }
 0x18f   : > { %1977 = vperm.xlu0 %2183, %v1974_v41   ;;  %1804 = vrot.lane.b32.xlu1 %v1207_v40, %s2255_s20  ;;  %s2133_s20 = sshll.u32 %s2314_s25, 8  ;;  %s2189_s25 = sshll.u32 %s2257_s15, 4  ;;  %s2190_s25 = int_to_ptr.vmem [resolvable:$false] %s2189_s25 }
 0x190   : > { %s1999_s28 = scalar_lea.hbm %s2740_s6, %s2133_s20  ;;  %s2191_s10 = scalar_lea.vmem %s2190_s25, 512 }
 0x193   : > { %1890 = vrot.lane.b32.xlu1 %v1207_v40, %s2256_s26  ;;  %s244_s26 = scalar_lea.vmem [#allocation2], %s2064_s19 }
 0x194   : > { %s2001_s11 = sshll.u32 %s244_s26, 4  ;;  %s2002_s11 = int_to_ptr.vmem [resolvable:$true] %s2001_s11 }
 0x195   : > { %s2185_s9 = scalar_lea.vmem %s2002_s11, 256  ;;  %p2192_p0 = scmp.lt.s32.totalorder %s2002_s11, %s2190_s25 }
 0x196   : > { %p2186_p11 = scmp.ne.s32.totalorder %s2002_s11, %s2185_s9  ;;  %p2193_p1 = scmp.lt.s32.totalorder %s2191_s10, %s2185_s9 }
 0x198   : > { %p2187_p12 = pnand %p2186_p11, %p2331_p5  ;;  %p2194_p2 = por %p2193_p1, %p2192_p0 }
 0x19a   : > { %p2188_p13 = pneg %p2187_p12 }
 0x19c   : > { %p2195_p3 = pnand %p2194_p2, %p2188_p13 }
 0x1e5   : > { %v1209_v9 = vpop.permute.xlu0 %1208  ;;  %v1218_v10 = vpop.permute.xlu1 %1217 }
 0x1e9   : > { %v1377_v42 = vpop.permute.xlu0 %1376  ;;  %v1220_v44 = vpop.permute.xlu1 %1219 }
 0x1ea   : > { %v1221_v45 = vsel %vm282_vm3, %v1218_v10, %v1220_v44  ;;  %v1222_v46 = vsel %vm282_vm3, %v1220_v44, %v1218_v10 }
 0x1eb   : > { %v1223_v47 = vmul.f32 %v1222_v46, %v2424_v28  ;;  %v1224_v48 = vmul.f32 %v1221_v45, %v2427_v29  ;;  %v1216_v29 = vld [vmem:[%s2737_s3] sm:$0xff] }
 0x1ed   : > { %v1463_v50 = vpop.permute.xlu0 %1462  ;;  %1261 = vmatprep.subr.mxu1 %v1224_v48  ;;  %v1211_v51 = vpop.permute.xlu1 %1210 }
 0x1ee   : > { %v1212_v52 = vsel %vm260_vm0, %v1209_v9, %v1211_v51  ;;  %v1213_v54 = vsel %vm260_vm0, %v1211_v51, %v1209_v9  ;;  %1262 = vmatpush1.msra.mxu1 %v1223_v47 }
 0x1ef   : > { %v1214_v55 = vmul.f32 %v1213_v54, %v2399_v16  ;;  %v1215_v28 = vmul.f32 %v1212_v52, %v2402_v17  ;;  %2111 = vmatmul.mubr.msk.f32.vlgmr.msra.gmra.mxu1 %vm1227_vm10, %v2110_v49 }
 0x1f0   : > { %1453 = vmatprep.mubr.f32.mxu1 %v2249_v2 }
 0x1f1   : > { %1335 = vmatprep.subr.mxu0 %v1215_v28  ;;  %v1379_v57 = vpop.permute.xlu1 %1378  ;;  %v1631_v16 = vpop.permute.xlu0 %1630 }
 0x1f2   : > { %v1380_v58 = vsel %vm468_vm2, %v1377_v42, %v1379_v57  ;;  %v1381_v59 = vsel %vm468_vm2, %v1379_v57, %v1377_v42  ;;  %1336 = vmatpush1.msra.mxu0 %v1214_v55 }
 0x1f3   : > { %v1382_v17 = vmul.f32 %v1381_v59, %v2435_v31  ;;  %v1383_v60 = vmul.f32 %v1380_v58, %v2438_v32  ;;  %2112 = vmatmul.mubr.msk.f32.vlgmr.msra.gmra.mxu0 %vm1227_vm10, %v1216_v29  ;;  %v1550_v32 = vmul.f32 %v1206_v39, %v2392_v14 }
 0x1f4   : > { %1539 = vmatprep.mubr.f32.mxu0 %v2249_v2 }
 0x1f5   : > { %1419 = vmatprep.subr.mxu1 %v1383_v60  ;;  %v1465_v62 = vpop.permute.xlu1 %1464  ;;  %v1717_v7 = vpop.permute.xlu0 %1716 }
 0x1f6   : > { %v1466_v1 = vsel %vm574_vm4, %v1463_v50, %v1465_v62  ;;  %v1467_v31 = vsel %vm574_vm4, %v1465_v62, %v1463_v50  ;;  %1420 = vmatpush1.msra.mxu1 %v1382_v17 }
 0x1f7   : > { %v1468_v3 = vmul.f32 %v1467_v31, %v2441_v35  ;;  %v1469_v5 = vmul.f32 %v1466_v1, %v2456_v43  ;;  %1587 = vmatprep.subr.mxu1 %v1551_v63  ;;  %2114 = vmatmul.mubr.msk.f32.vlgmr.msra.gmra.mxu1 %vm1227_vm10, %v2113_v61 }
 0x1f8   : > { %1588 = vmatpush1.msra.mxu1 %v1550_v32  ;;  %1621 = vmatprep.mubr.f32.mxu1 %v2249_v2 }
 0x1f9   : > { %1505 = vmatprep.subr.mxu0 %v1469_v5  ;;  %v1633_v14 = vpop.permute.xlu1 %1632 }
 0x1fa   : > { %v1634_v35 = vsel %vm778_vm6, %v1631_v16, %v1633_v14  ;;  %v1635_v43 = vsel %vm778_vm6, %v1633_v14, %v1631_v16  ;;  %1506 = vmatpush1.msra.mxu0 %v1468_v3 }
 0x1fb   : > { %v1636_v11 = vmul.f32 %v1634_v35, %v2475_v53  ;;  %v1637_v12 = vmul.f32 %v1635_v43, %v2483_v56  ;;  %2116 = vmatmul.mubr.msk.f32.vlgmr.msra.gmra.mxu0 %vm1227_vm10, %v2115_v15  ;;  %2118 = vmatmul.mubr.msk.f32.vlgmr.msra.gmra.mxu1 %vm1227_vm10, %v2117_v6  ;;  %v1803_v56 = vpop.permute.xlu0 %1802 }
 0x1fc   : > { %1707 = vmatprep.mubr.f32.mxu0 %v2249_v2  ;;  %1793 = vmatprep.mubr.f32.mxu1 %v2249_v2 }
 0x1fd   : > { %1673 = vmatprep.subr.mxu0 %v1637_v12  ;;  %v1719_v18 = vpop.permute.xlu1 %1718 }
 0x1fe   : > { %v1720_v20 = vsel %vm884_vm7, %v1717_v7, %v1719_v18  ;;  %v1721_v53 = vsel %vm884_vm7, %v1719_v18, %v1717_v7  ;;  %1674 = vmatpush1.msra.mxu0 %v1636_v11 }
 0x1ff   : > { %v1722_v21 = vmul.f32 %v1720_v20, %v2504_v0  ;;  %v1723_v23 = vmul.f32 %v1721_v53, %v2512_v4  ;;  %2120 = vmatmul.mubr.msk.f32.vlgmr.msra.gmra.mxu0 %vm1227_vm10, %v2119_v13  ;;  %v1889_v33 = vpop.permute.xlu0 %1888 }
 0x200   : > { %1879 = vmatprep.mubr.f32.mxu0 %v2249_v2 }
 0x201   : > { %v1805_v25 = vpop.permute.xlu1 %1804  ;;  %1759 = vmatprep.subr.mxu1 %v1723_v23 }
 0x202   : > { %v1806_v26 = vsel %vm990_vm8, %v1803_v56, %v1805_v25  ;;  %v1807_v27 = vsel %vm990_vm8, %v1805_v25, %v1803_v56  ;;  %1760 = vmatpush1.msra.mxu1 %v1722_v21 }
 0x203   : > { %v1808_v0 = vmul.f32 %v1806_v26, %v2533_v19  ;;  %v1809_v4 = vmul.f32 %v1807_v27, %v2541_v22  ;;  %2122 = vmatmul.mubr.msk.f32.vlgmr.msra.gmra.mxu1 %vm1227_vm10, %v2121_v24 }
 0x204   : > { %1965 = vmatprep.mubr.f32.mxu1 %v2249_v2  ;;  %v2125_v2 = vld [vmem:[%s2737_s3 + $0x40] sm:$0xff] }
 0x205   : > { %1845 = vmatprep.subr.mxu0 %v1809_v4  ;;  %v1891_v34 = vpop.permute.xlu1 %1890 }
 0x206   : > { %v1892_v38 = vsel %vm1096_vm9, %v1889_v33, %v1891_v34  ;;  %v1893_v39 = vsel %vm1096_vm9, %v1891_v34, %v1889_v33  ;;  %1846 = vmatpush1.msra.mxu0 %v1808_v0 }
 0x207   : > { %v1894_v19 = vmul.f32 %v1892_v38, %v2562_v36  ;;  %v1895_v22 = vmul.f32 %v1893_v39, %v2565_v37  ;;  %2124 = vmatmul.mubr.msk.f32.vlgmr.msra.gmra.mxu0 %vm1227_vm10, %v2123_v30 }
 0x209   : > { %1931 = vmatprep.subr.mxu1 %v1895_v22 }
 0x20a   : > { %1932 = vmatpush1.msra.mxu1 %v1894_v19  ;;  %v1978_v32 = vpop.permute.xlu0 %1977 }
 0x20b   : > { %2126 = vmatmul.mubr.msk.f32.vlgmr.msra.gmra.mxu1 %vm1227_vm10, %v2125_v2 }
 0x2af   : > { %v1297_v40 = vpop.f32.mrf.mxu1 }
 0x2b1   : > { %v1299_v41 = vpop.f32.mrf.mxu1 }
 0x2b3   : > { %v1371_v9 = vpop.f32.mrf.mxu0 }
 0x2b4   : > { %v1372_v8 = vadd.f32 %v1371_v9, %v1297_v40 }
 0x2b5   : > { %v1373_v10 = vpop.f32.mrf.mxu0 }
 0x2b6   : > { %v1374_v42 = vadd.f32 %v1373_v10, %v1299_v41 }
 0x2b7   : > { %v1455_v44 = vpop.f32.mrf.mxu1 }
 0x2b8   : > { %v1460_v36 = vadd.f32 %v1455_v44, %v1372_v8 }
 0x2b9   : > { %v1457_v45 = vpop.f32.mrf.mxu1 }
 0x2ba   : > { %v1461_v37 = vadd.f32 %v1457_v45, %v1374_v42 }
 0x2bb   : > { %v1541_v46 = vpop.f32.mrf.mxu0  ;;  %v1623_v47 = vpop.f32.mrf.mxu1 }
 0x2bc   : > { %v1546_v48 = vadd.f32 %v1541_v46, %v1460_v36 }
 0x2bd   : > { %v1543_v49 = vpop.f32.mrf.mxu0  ;;  %v1625_v52 = vpop.f32.mrf.mxu1 }
 0x2be   : > { %v1547_v50 = vadd.f32 %v1543_v49, %v1461_v37  ;;  %v1628_v51 = vadd.f32 %v1623_v47, %v1546_v48 }
 0x2bf   : > { %v1709_v54 = vpop.f32.mrf.mxu0 }
 0x2c0   : > { %v1629_v55 = vadd.f32 %v1625_v52, %v1547_v50  ;;  %v1714_v28 = vadd.f32 %v1709_v54, %v1628_v51 }
 0x2c1   : > { %v1711_v29 = vpop.f32.mrf.mxu0 }
 0x2c2   : > { %v1715_v58 = vadd.f32 %v1711_v29, %v1629_v55 }
 0x2c3   : > { %v1795_v57 = vpop.f32.mrf.mxu1 }
 0x2c4   : > { %v1800_v59 = vadd.f32 %v1795_v57, %v1714_v28 }
 0x2c5   : > { %v1797_v16 = vpop.f32.mrf.mxu1 }
 0x2c6   : > { %v1801_v61 = vadd.f32 %v1797_v16, %v1715_v58 }
 0x2c7   : > { %v1881_v17 = vpop.f32.mrf.mxu0 }
 0x2c8   : > { %v1886_v62 = vadd.f32 %v1881_v17, %v1800_v59 }
 0x2c9   : > { %v1883_v60 = vpop.f32.mrf.mxu0 }
 0x2ca   : > { %v1887_v1 = vadd.f32 %v1883_v60, %v1801_v61 }
 0x2cb   : > { %v1967_v63 = vpop.f32.mrf.mxu1 }
 0x2cc   : > { %v1972_v31 = vadd.f32 %v1967_v63, %v1886_v62 }
 0x2cd   : > { %v1969_v3 = vpop.f32.mrf.mxu1 }
 0x2ce   : > { %v1980_v5 = vadd.f32 %v1978_v32, %v1972_v31  ;;  %v1973_v15 = vadd.f32 %v1969_v3, %v1887_v1 }
 0x2d0   : > { %v1982_v6 = vmax.f32 %v1980_v5, 0.0  ;;  %v1981_v7 = vadd.f32 %v1978_v32, %v1973_v15 }
 0x2d2   : > { %1984 = vst [vmem:[%s244_s26] sm:$0xff] %v1982_v6  ;;  %v1983_v14 = vmax.f32 %v1981_v7, 0.0 }
 0x2d4   : > { %1985 = vst [vmem:[%s244_s26 + $0x8] sm:$0xff] %v1983_v14 }
 0x2d5   : > { %2198 = shalt.err (!%p2195_p3)
}
 0x2d6   : > { %s2199_s14 = scalar_lea.hbm %s1999_s28, 256  ;;  %s2203_s18 = scalar_lea.hbm %s2740_s6, 512 }
 0x2d7   : > { %p2200_p4 = scmp.ne.s32.totalorder %s1999_s28, %s2199_s14  ;;  %p2204_p9 = scmp.lt.s32.totalorder %s1999_s28, %s2740_s6 }
 0x2d8   : > { %p2205_p10 = scmp.lt.s32.totalorder %s2203_s18, %s2199_s14 }
 0x2d9   : > { %p2201_p7 = pnand %p2200_p4, %p2331_p5 }
 0x2da   : > { %p2206_p11 = por %p2205_p10, %p2204_p9 }
 0x2db   : > { %p2202_p8 = pneg %p2201_p7 }
 0x2dd   : > { %p2207_p12 = pnand %p2206_p11, %p2202_p8 }
 0x2df   : > { %2210 = shalt.err (!%p2207_p12)
}
 0x2e0   : > { %2134 = dma.vmem_to_hbm [thread:$0]  (%p2331_p5), %s2002_s11, 256, %s1999_s28, %s1987_s29  }
 0x2e1 PF: > { %p2140_p13 = scmp.ge.s32.totalorder %s2245_s24, 2  ;;  %s2013_s26 = sand.u32 1, %s2233_s21  }
 0x2e2   : > { %s2014_s12 = scalar_lea.sflag [#allocation3], %s2013_s26 }
 0x2e3   : > { %p2137_p0 = pnand %p2140_p13, %p2335_p6 }
 0x2e5   : > { %p2138_p1 = pneg %p2137_p0 }
 0x2e7   : > { %2228 = dma.done.wait (%p2138_p1), %s2014_s12, 256  }
 0x2e8   : > { %2230 = vsyncadd (%p2138_p1), %s2014_s12, 4294967040  ;;  %p16_p2 = scmp.ge.s32.totalorder %s2318_s27, 4   ;;  %s2743_s21 = smov %s2237_s22 }
 0x2e9   : > { %s2744_s22 = smov %s2241_s23  ;;  %s2745_s23 = smov %s2329_s30 }
 0x2ea   : > { %s2746_s24 = smov %s2318_s27  ;;  %18 = sbr.rel (!%p16_p2) target bundleno = 3 (0x3), region = 103 }
 0x2ef   :  { %2019 = vsyncpa [#allocation3], 1 }
 0x2f0   :  { %2021 = vsyncpa [#allocation3 + $0x1], 1 }

</bundles_post_ra>
